<compile_context>
chip_gen: v5e
topology: v5e:2x2
jax: 0.10.0
libtpu: 0.0.40
codegen_flags: <defaults>
</compile_context>

<pallas_src>
import functools

import jax
import jax.numpy as jnp
import numpy as np
from jax import lax
from jax.experimental import pallas as pl
from jax.experimental.pallas import tpu as pltpu


# ----------------------------------------------------------------------------
# In-kernel helper: valid 3x3 conv (+ folded BN affine + bias) + ReLU on a
# flat-spatial activation, as ONE matmul with spatial in the lane dim.
#   x:     (C, Lin) f32, flattened spatial with row stride `row_stride`.
#   w_aug: (Co, 9*C + 1) f32; column k=(dy*3+dx)*C+ci holds w[dy,dx,ci,co]*scale[co],
#          last column holds the folded bias (paired with an all-ones patch row).
# Returns (Co, L) with L=(out_rows-1)*row_stride+out_cols; columns with
# (col % row_stride) >= out_cols are garbage and ignored downstream.
# ----------------------------------------------------------------------------
def _conv3x3_flat_relu(x, w_aug, *, row_stride, out_rows, out_cols):
    L = (out_rows - 1) * row_stride + out_cols
    pieces = [x[:, dy * row_stride + dx: dy * row_stride + dx + L]
              for dy in range(3) for dx in range(3)]
    pieces.append(jnp.ones((1, L), dtype=x.dtype))                 # bias row
    patches = jnp.concatenate(pieces, axis=0)                      # (9C+1, L)
    acc = jnp.dot(w_aug, patches, preferred_element_type=jnp.float32)   # (Co, L)
    return jnp.maximum(acc, 0.0)                                   # ReLU only epilogue


# ----------------------------------------------------------------------------
# Fused kernel: conv1+BN+ReLU -> conv2+BN+ReLU -> Dropout(p=0) -> deconv 2x2/2.
# One grid step = one batch element; all intermediates stay in VMEM/vregs.
# Output layout: (4*Cout, L2) where row = (p*2+q)*Cout + co, column = oh*W + ow.
# ----------------------------------------------------------------------------
def decoder_block_kernel(x_ref, w1_ref, w2_ref, wt_ref, o_ref,
                         *, W, Ho, Wo, Ho2, Wo2):
    x = x_ref[0]                                                   # (Cin, H*W) f32
    y1 = _conv3x3_flat_relu(x, w1_ref[...], row_stride=W, out_rows=Ho, out_cols=Wo)
    y2 = _conv3x3_flat_relu(y1, w2_ref[...], row_stride=W, out_rows=Ho2, out_cols=Wo2)
    # Dropout(p=0.0) -> identity.
    L2 = y2.shape[-1]
    y2_aug = jnp.concatenate([y2, jnp.ones((1, L2), y2.dtype)], axis=0)  # (Cmid+1, L2)
    # ConvTranspose2d(k=2, s=2): k == stride => no overlap => one matmul Cmid -> 4*Cout.
    o_ref[0] = jnp.dot(wt_ref[...], y2_aug, preferred_element_type=jnp.float32)


def _fold_bn(conv_bias, gamma, beta, mean, var, eps=1e-5):
    scale = gamma / jnp.sqrt(var + eps)
    bias = (conv_bias - mean) * scale + beta
    return scale, bias


def decoder_block_forward(x_nchw, p):
    N, Cin, H, W = x_nchw.shape
    assert H >= 5 and W >= 5, "two VALID 3x3 convs need H, W >= 5"
    Cmid = p["w1"].shape[-1]
    Cout = p["wt"].shape[-1]
    Ho, Wo = H - 2, W - 2
    Ho2, Wo2 = H - 4, W - 4
    L2 = (Ho2 - 1) * W + Wo2                                       # kernel's flat out length

    s1, b1 = _fold_bn(p["b1"], p["g1"], p["be1"], p["m1"], p["v1"])
    s2, b2 = _fold_bn(p["b2"], p["g2"], p["be2"], p["m2"], p["v2"])

    # (dy,dx,ci,co) -> (co, (dy*3+dx)*cin + ci), BN scale folded into rows,
    # folded bias appended as the last column (matches the ones-row in patches).
    def prep_conv(w_hwio, scale, bias, cin, cout):
        wm = jnp.transpose(w_hwio, (3, 0, 1, 2)).reshape(cout, 9 * cin) * scale[:, None]
        return jnp.concatenate([wm, bias[:, None]], axis=1).astype(jnp.float32)

    w1a = prep_conv(p["w1"], s1, b1, Cin, Cmid)                    # (Cmid, 9*Cin+1)
    w2a = prep_conv(p["w2"], s2, b2, Cmid, Cmid)                   # (Cmid, 9*Cmid+1)

    # deconv weight (p,q,ci,co) -> ((p*2+q)*Cout + co, ci), bias appended last.
    wtm = jnp.transpose(p["wt"], (0, 1, 3, 2)).reshape(4 * Cout, Cmid)
    wta = jnp.concatenate([wtm, jnp.tile(p["bt"], 4)[:, None]], axis=1).astype(jnp.float32)

    # NCHW is already (C, H*W)-major: this reshape is free (no transpose).
    x_flat = x_nchw.reshape(N, Cin, H * W).astype(jnp.float32)

    kernel = functools.partial(decoder_block_kernel, W=W, Ho=Ho, Wo=Wo, Ho2=Ho2, Wo2=Wo2)

    z = pl.pallas_call(
        kernel,
        out_shape=jax.ShapeDtypeStruct((N, 4 * Cout, L2), jnp.float32),
        grid=(N,),
        in_specs=[
            pl.BlockSpec((1, Cin, H * W), lambda n: (n, 0, 0)),
            pl.BlockSpec((Cmid, 9 * Cin + 1), lambda n: (0, 0)),
            pl.BlockSpec((Cmid, 9 * Cmid + 1), lambda n: (0, 0)),
            pl.BlockSpec((4 * Cout, Cmid + 1), lambda n: (0, 0)),
        ],
        out_specs=pl.BlockSpec((1, 4 * Cout, L2), lambda n: (n, 0, 0)),
        compiler_params=pltpu.CompilerParams(
            dimension_semantics=("parallel",),      # batch across v7x's 2 TCs
            vmem_limit_bytes=32 * 1024 * 1024,
        ),
    )(x_flat, w1a, w2a, wta)

    # Tiny XLA epilogue on the final output: crop garbage columns (ow >= Wo2)
    # and un-interleave sub-pixels: z[n, (p*2+q)*Cout+co, oh*W+ow] -> out[n, co, 2oh+p, 2ow+q].
    z = jnp.pad(z, ((0, 0), (0, 0), (0, Ho2 * W - L2)))
    z = z.reshape(N, 2, 2, Cout, Ho2, W)[:, :, :, :, :, :Wo2]      # (n,p,q,co,h,w)
    out = jnp.transpose(z, (0, 3, 4, 1, 5, 2)).reshape(N, Cout, 2 * Ho2, 2 * Wo2)
    return out


# ----------------------------------------------------------------------------
# Pure-JAX reference (independent formulation, f32 HIGHEST) for a sanity check.
# ----------------------------------------------------------------------------
def reference_forward(x_nchw, p, eps=1e-5):
    dn = ("NHWC", "HWIO", "NHWC")
    x = jnp.transpose(x_nchw, (0, 2, 3, 1))
    z = lax.conv_general_dilated(x, p["w1"], (1, 1), "VALID", dimension_numbers=dn,
                                 precision=lax.Precision.HIGHEST) + p["b1"]
    z = jnp.maximum((z - p["m1"]) / jnp.sqrt(p["v1"] + eps) * p["g1"] + p["be1"], 0.0)
    z = lax.conv_general_dilated(z, p["w2"], (1, 1), "VALID", dimension_numbers=dn,
                                 precision=lax.Precision.HIGHEST) + p["b2"]
    z = jnp.maximum((z - p["m2"]) / jnp.sqrt(p["v2"] + eps) * p["g2"] + p["be2"], 0.0)
    N, H, W, Cm = z.shape
    Cout = p["wt"].shape[-1]
    t = jnp.einsum("nhwi,pqio->nhpwqo", z, p["wt"], precision=lax.Precision.HIGHEST)
    t = t.reshape(N, 2 * H, 2 * W, Cout) + p["bt"]
    return jnp.transpose(t, (0, 3, 1, 2))


if __name__ == "__main__":
    key = jax.random.PRNGKey(0)
    N, Cin, H, W = 2, 4, 16, 16
    Cmid, Cout = 8, 4

    ks = jax.random.split(key, 16)
    x = jax.random.normal(ks[0], (N, Cin, H, W), jnp.float32)

    params = {
        # conv1: PyTorch weight (Cmid, Cin, 3, 3) stored here directly as HWIO (3,3,Cin,Cmid)
        "w1": 0.1 * jax.random.normal(ks[1], (3, 3, Cin, Cmid), jnp.float32),
        "b1": 0.1 * jax.random.normal(ks[2], (Cmid,), jnp.float32),
        "g1": 1.0 + 0.1 * jax.random.normal(ks[3], (Cmid,), jnp.float32),
        "be1": 0.1 * jax.random.normal(ks[4], (Cmid,), jnp.float32),
        "m1": 0.1 * jax.random.normal(ks[5], (Cmid,), jnp.float32),
        "v1": 1.0 + 0.1 * jnp.abs(jax.random.normal(ks[6], (Cmid,), jnp.float32)),
        # conv2
        "w2": 0.1 * jax.random.normal(ks[7], (3, 3, Cmid, Cmid), jnp.float32),
        "b2": 0.1 * jax.random.normal(ks[8], (Cmid,), jnp.float32),
        "g2": 1.0 + 0.1 * jax.random.normal(ks[9], (Cmid,), jnp.float32),
        "be2": 0.1 * jax.random.normal(ks[10], (Cmid,), jnp.float32),
        "m2": 0.1 * jax.random.normal(ks[11], (Cmid,), jnp.float32),
        "v2": 1.0 + 0.1 * jnp.abs(jax.random.normal(ks[12], (Cmid,), jnp.float32)),
        # convTranspose: PyTorch weight (Cmid, Cout, 2, 2) stored here as (2,2,Cmid,Cout)
        "wt": 0.1 * jax.random.normal(ks[13], (2, 2, Cmid, Cout), jnp.float32),
        "bt": 0.1 * jax.random.normal(ks[14], (Cout,), jnp.float32),
    }

    out = jax.jit(decoder_block_forward)(x, params)
    out = jax.block_until_ready(out)

    assert out.shape == (N, Cout, 2 * (H - 4), 2 * (W - 4)), out.shape   # (2, 4, 24, 24)
    ref = reference_forward(x, params)
    np.testing.assert_allclose(np.asarray(out), np.asarray(ref), rtol=2e-2, atol=2e-2)

    print("KERNEL_OK")
</pallas_src>

<mosaic_0001>
module attributes {stable_mosaic.version = 11 : i64} {
  func.func @decoder_block_kernel(%arg0: i32, %arg1: memref<1x4x256xf32, #tpu.memory_space<vmem>>, %arg2: memref<8x37xf32, #tpu.memory_space<vmem>>, %arg3: memref<8x73xf32, #tpu.memory_space<vmem>>, %arg4: memref<16x9xf32, #tpu.memory_space<vmem>>, %arg5: memref<1x16x188xf32, #tpu.memory_space<vmem>>) attributes {dimension_semantics = [#tpu.dimension_semantics<parallel>], iteration_bounds = array<i64: 2>, scalar_prefetch = 0 : i64, scratch_operands = 0 : i64, tpu.core_type = #tpu.core_type<tc>, window_params = [{transform_indices = @transform_0, window_bounds = array<i64: 1, 4, 256>}, {pipeline_mode = #tpu.pipeline_mode<synchronous>, transform_indices = @transform_1, window_bounds = array<i64: 8, 37>}, {pipeline_mode = #tpu.pipeline_mode<synchronous>, transform_indices = @transform_2, window_bounds = array<i64: 8, 73>}, {pipeline_mode = #tpu.pipeline_mode<synchronous>, transform_indices = @transform_3, window_bounds = array<i64: 16, 9>}, {transform_indices = @transform_4, window_bounds = array<i64: 1, 16, 188>}]} {
    %c0 = arith.constant 0 : index
    %c0_0 = arith.constant 0 : index
    %c0_1 = arith.constant 0 : index
    %0 = vector.load %arg1[%c0, %c0_0, %c0_1] : memref<1x4x256xf32, #tpu.memory_space<vmem>>, vector<1x4x256xf32>
    %1 = vector.shape_cast %0 : vector<1x4x256xf32> to vector<4x256xf32>
    %c0_2 = arith.constant 0 : index
    %c0_3 = arith.constant 0 : index
    %2 = vector.load %arg2[%c0_2, %c0_3] : memref<8x37xf32, #tpu.memory_space<vmem>>, vector<8x37xf32>
    %3 = vector.extract_strided_slice %1 {offsets = [0, 0], sizes = [4, 222], strides = [1, 1]} : vector<4x256xf32> to vector<4x222xf32>
    %4 = vector.extract_strided_slice %1 {offsets = [0, 1], sizes = [4, 222], strides = [1, 1]} : vector<4x256xf32> to vector<4x222xf32>
    %5 = vector.extract_strided_slice %1 {offsets = [0, 2], sizes = [4, 222], strides = [1, 1]} : vector<4x256xf32> to vector<4x222xf32>
    %6 = vector.extract_strided_slice %1 {offsets = [0, 16], sizes = [4, 222], strides = [1, 1]} : vector<4x256xf32> to vector<4x222xf32>
    %7 = vector.extract_strided_slice %1 {offsets = [0, 17], sizes = [4, 222], strides = [1, 1]} : vector<4x256xf32> to vector<4x222xf32>
    %8 = vector.extract_strided_slice %1 {offsets = [0, 18], sizes = [4, 222], strides = [1, 1]} : vector<4x256xf32> to vector<4x222xf32>
    %9 = vector.extract_strided_slice %1 {offsets = [0, 32], sizes = [4, 222], strides = [1, 1]} : vector<4x256xf32> to vector<4x222xf32>
    %10 = vector.extract_strided_slice %1 {offsets = [0, 33], sizes = [4, 222], strides = [1, 1]} : vector<4x256xf32> to vector<4x222xf32>
    %11 = vector.extract_strided_slice %1 {offsets = [0, 34], sizes = [4, 222], strides = [1, 1]} : vector<4x256xf32> to vector<4x222xf32>
    %cst = arith.constant 1.000000e+00 : f32
    %12 = vector.broadcast %cst : f32 to vector<1x222xf32>
    %13 = tpu.concatenate %3, %4, %5, %6, %7, %8, %9, %10, %11, %12 in 0 : vector<4x222xf32>, vector<4x222xf32>, vector<4x222xf32>, vector<4x222xf32>, vector<4x222xf32>, vector<4x222xf32>, vector<4x222xf32>, vector<4x222xf32>, vector<4x222xf32>, vector<1x222xf32> -> vector<37x222xf32>
    %cst_4 = arith.constant dense<0.000000e+00> : vector<8x222xf32>
    %14 = tpu.matmul %2, %13, %cst_4 {dimension_numbers = #tpu.dot_dimension_numbers<[1], [0], [0], [1], [0, 0, 1, 1], [], []>} : vector<8x37xf32>, vector<37x222xf32>, vector<8x222xf32> -> vector<8x222xf32>
    %cst_5 = arith.constant 0.000000e+00 : f32
    %15 = vector.broadcast %cst_5 : f32 to vector<8x222xf32>
    %16 = arith.maximumf %14, %15 : vector<8x222xf32>
    %c0_6 = arith.constant 0 : index
    %c0_7 = arith.constant 0 : index
    %17 = vector.load %arg3[%c0_6, %c0_7] : memref<8x73xf32, #tpu.memory_space<vmem>>, vector<8x73xf32>
    %18 = vector.extract_strided_slice %16 {offsets = [0, 0], sizes = [8, 188], strides = [1, 1]} : vector<8x222xf32> to vector<8x188xf32>
    %19 = vector.extract_strided_slice %16 {offsets = [0, 1], sizes = [8, 188], strides = [1, 1]} : vector<8x222xf32> to vector<8x188xf32>
    %20 = vector.extract_strided_slice %16 {offsets = [0, 2], sizes = [8, 188], strides = [1, 1]} : vector<8x222xf32> to vector<8x188xf32>
    %21 = vector.extract_strided_slice %16 {offsets = [0, 16], sizes = [8, 188], strides = [1, 1]} : vector<8x222xf32> to vector<8x188xf32>
    %22 = vector.extract_strided_slice %16 {offsets = [0, 17], sizes = [8, 188], strides = [1, 1]} : vector<8x222xf32> to vector<8x188xf32>
    %23 = vector.extract_strided_slice %16 {offsets = [0, 18], sizes = [8, 188], strides = [1, 1]} : vector<8x222xf32> to vector<8x188xf32>
    %24 = vector.extract_strided_slice %16 {offsets = [0, 32], sizes = [8, 188], strides = [1, 1]} : vector<8x222xf32> to vector<8x188xf32>
    %25 = vector.extract_strided_slice %16 {offsets = [0, 33], sizes = [8, 188], strides = [1, 1]} : vector<8x222xf32> to vector<8x188xf32>
    %26 = vector.extract_strided_slice %16 {offsets = [0, 34], sizes = [8, 188], strides = [1, 1]} : vector<8x222xf32> to vector<8x188xf32>
    %cst_8 = arith.constant 1.000000e+00 : f32
    %27 = vector.broadcast %cst_8 : f32 to vector<1x188xf32>
    %28 = tpu.concatenate %18, %19, %20, %21, %22, %23, %24, %25, %26, %27 in 0 : vector<8x188xf32>, vector<8x188xf32>, vector<8x188xf32>, vector<8x188xf32>, vector<8x188xf32>, vector<8x188xf32>, vector<8x188xf32>, vector<8x188xf32>, vector<8x188xf32>, vector<1x188xf32> -> vector<73x188xf32>
    %cst_9 = arith.constant dense<0.000000e+00> : vector<8x188xf32>
    %29 = tpu.matmul %17, %28, %cst_9 {dimension_numbers = #tpu.dot_dimension_numbers<[1], [0], [0], [1], [0, 0, 1, 1], [], []>} : vector<8x73xf32>, vector<73x188xf32>, vector<8x188xf32> -> vector<8x188xf32>
    %cst_10 = arith.constant 0.000000e+00 : f32
    %30 = vector.broadcast %cst_10 : f32 to vector<8x188xf32>
    %31 = arith.maximumf %29, %30 : vector<8x188xf32>
    %cst_11 = arith.constant 1.000000e+00 : f32
    %32 = vector.broadcast %cst_11 : f32 to vector<1x188xf32>
    %33 = tpu.concatenate %31, %32 in 0 : vector<8x188xf32>, vector<1x188xf32> -> vector<9x188xf32>
    %c0_12 = arith.constant 0 : index
    %c0_13 = arith.constant 0 : index
    %34 = vector.load %arg4[%c0_12, %c0_13] : memref<16x9xf32, #tpu.memory_space<vmem>>, vector<16x9xf32>
    %cst_14 = arith.constant dense<0.000000e+00> : vector<16x188xf32>
    %35 = tpu.matmul %34, %33, %cst_14 {dimension_numbers = #tpu.dot_dimension_numbers<[1], [0], [0], [1], [0, 0, 1, 1], [], []>} : vector<16x9xf32>, vector<9x188xf32>, vector<16x188xf32> -> vector<16x188xf32>
    %c0_15 = arith.constant 0 : index
    %c0_16 = arith.constant 0 : index
    %c0_17 = arith.constant 0 : index
    %36 = vector.load %arg5[%c0_15, %c0_16, %c0_17] : memref<1x16x188xf32, #tpu.memory_space<vmem>>, vector<1x16x188xf32>
    %37 = vector.shape_cast %36 : vector<1x16x188xf32> to vector<16x188xf32>
    %38 = vector.shape_cast %35 : vector<16x188xf32> to vector<1x16x188xf32>
    tpu.vector_store %arg5[%c0_15, %c0_16, %c0_17], %38 {strides = array<i32>} : memref<1x16x188xf32, #tpu.memory_space<vmem>>, vector<1x16x188xf32>,
    return
  }
  func.func @transform_0(%arg0: i32) -> (i32, i32, i32) {
    %c0_i32 = arith.constant 0 : i32
    %c0_i32_0 = arith.constant 0 : i32
    %c0_i32_1 = arith.constant 0 : i32
    return %arg0, %c0_i32, %c0_i32_0 : i32, i32, i32
  }
  func.func @transform_1(%arg0: i32) -> (i32, i32) {
    %c0_i32 = arith.constant 0 : i32
    %c0_i32_0 = arith.constant 0 : i32
    %c0_i32_1 = arith.constant 0 : i32
    return %c0_i32, %c0_i32_0 : i32, i32
  }
  func.func @transform_2(%arg0: i32) -> (i32, i32) {
    %c0_i32 = arith.constant 0 : i32
    %c0_i32_0 = arith.constant 0 : i32
    %c0_i32_1 = arith.constant 0 : i32
    return %c0_i32, %c0_i32_0 : i32, i32
  }
  func.func @transform_3(%arg0: i32) -> (i32, i32) {
    %c0_i32 = arith.constant 0 : i32
    %c0_i32_0 = arith.constant 0 : i32
    %c0_i32_1 = arith.constant 0 : i32
    return %c0_i32, %c0_i32_0 : i32, i32
  }
  func.func @transform_4(%arg0: i32) -> (i32, i32, i32) {
    %c0_i32 = arith.constant 0 : i32
    %c0_i32_0 = arith.constant 0 : i32
    %c0_i32_1 = arith.constant 0 : i32
    return %arg0, %c0_i32, %c0_i32_0 : i32, i32, i32
  }
}

</mosaic_0001>

<bundles_post_ra>
// kernel: tile.8
= control target key start
LH: loop header
LB: loop body
LE: loop exit
PB: predicated region body
PF: predicated region fallthrough
CT: control target
= control target key end

     0   :  { %s22_s0 = inlined_call_operand.vmem [shape: f32[4], index: 0, kind: input, shape index: {}]   ;;  %s23_s1 = inlined_call_operand.vmem [shape: f32[4,4], index: 1, kind: output, shape index: {}]  }
   0x1   :  { %v4_v0 = vld [vmem:[%s22_s0] ss:$0 sm:$0xff] }
   0x2   :  { %5 = vst [vmem:[%s23_s1] sm:$0xf] %v4_v0 }

// kernel: tile.0
= control target key start
LH: loop header
LB: loop body
LE: loop exit
PB: predicated region body
PF: predicated region fallthrough
CT: control target
= control target key end

     0   :  { %s34_s8 = smov 125   ;;  %s35_s9 = smov 126   ;;  %vm7_vm0 = vcmask 7168   ;;  %s61_s0 = inlined_call_operand.vmem [shape: f32[4,4], index: 0, kind: input, shape index: {}]   ;;  %s62_s1 = inlined_call_operand.vmem [shape: f32[16,1], index: 1, kind: output, shape index: {}]  }
   0x1   :  { %v4_v0 = vld [vmem:[%s61_s0] sm:$0xf]  ;;  %s33_s0 = smov 127  }
   0x2   :  { %5 = vst [vmem:[#allocation0] sm:$0xf] %v4_v0 }
   0x9   :  { %v9_v1 = vld [vmem:[#allocation0] sm:$0xf]  }
   0xa   :  { %v21_v2 = vld [vmem:[#allocation0] sm:$0xf]   ;;  %10 = vrot.lane.b32.xlu0 %v9_v1, %s33_s0 }
   0xb   :  { %22 = vrot.lane.b32.xlu1 %v21_v2, %s34_s8  ;;  %v15_v3 = vld [vmem:[#allocation0] sm:$0xf]  }
   0xc   :  { %v6_v4 = vld [vmem:[#allocation0] sm:$0xf]  }
   0xd   :  { %8 = vst.msk [vmem:[%s62_s1] ss:$4 sm:$0xf] %vm7_vm0, %v6_v4  }
  0x12   :  { %16 = vrot.lane.b32.xlu0 %v15_v3, %s35_s9 }
  0x7c   :  { %v11_v5 = vpop.permute.xlu0 %10  }
  0x7d   :  { %v23_v6 = vpop.permute.xlu1 %22   ;;  %27 = vst.msk [vmem:[%s62_s1 + $0x1] ss:$4 sm:$0xf] %vm7_vm0, %v11_v5  }
  0x7e   :  { %29 = vst.msk [vmem:[%s62_s1 + $0x3] ss:$4 sm:$0xf] %vm7_vm0, %v23_v6  }
  0x84   :  { %v17_v7 = vpop.permute.xlu0 %16  }
  0x85   :  { %28 = vst.msk [vmem:[%s62_s1 + $0x2] ss:$4 sm:$0xf] %vm7_vm0, %v17_v7  }

// kernel: decoder_block_forward.1
= control target key start
LH: loop header
LB: loop body
LE: loop exit
PB: predicated region body
PF: predicated region fallthrough
CT: control target
= control target key end

     0   :  { %s747_s15 = smov 0   ;;  %s843_s0 = inlined_call_operand.vmem [shape: f32[2,4,256], index: 0, kind: input, shape index: {}]   ;;  %s844_s1 = inlined_call_operand.vmem [shape: f32[8,37], index: 1, kind: input, shape index: {}]   ;;  %s845_s2 = inlined_call_operand.vmem [shape: f32[8,73], index: 2, kind: input, shape index: {}]   ;;  %s846_s3 = inlined_call_operand.vmem [shape: f32[16,9], index: 3, kind: input, shape index: {}]   ;;  %s847_s4 = inlined_call_operand.vmem [shape: f32[2,16,188], index: 4, kind: output, shape index: {}]  }
   0x1 LB: > { %s586_s16 = sadd.s32 4294967295, %s711_s15   ;;  %p590_p0 = scmp.ge.s32.totalorder %s711_s15, 1  ;;  %s711_s15 = sphi %s747_s15, %s14_s15  }
   0x2   : > { %p162_p1 = scmp.lt.s32.totalorder %s711_s15, 3 }
   0x4   : > { %p163_p2 = pnand %p590_p0, %p162_p1 }
   0x5   : > { %p188_p3 = scmp.lt.s32.totalorder (!%p163_p2), %s586_s16, 1  ;;  %s713_s21 = smov (!%p163_p2), 96  }
   0x6   : > { %166 = sbr.rel (%p163_p2) target bundleno = 765 (0x2fd), region = 36  ;;  %s714_s22 = smov (!%p163_p2), 111  }
   0x7   : > { %s715_s23 = smov (!%p163_p2), 95   ;;  %s716_s24 = smov (!%p163_p2), 110  }
   0x8   : > { %s717_s25 = smov (!%p163_p2), 94   ;;  %s718_s26 = smov (!%p163_p2), 112  }
   0x9   : > { %s719_s27 = smov (!%p163_p2), 127   ;;  %s720_s28 = smov (!%p163_p2), 126  }
   0xb   : > { %s849_s16 = smov (!%p188_p3, %s586_s16), 1  ;;  %vm294_vm0 = vcmask 769024   ;;  %vm271_vm1 = vcmask 785408   ;;  %vm283_vm2 = vcmask 777216   ;;  %vm313_vm3 = vcmask 1044480  }
   0xc   : > { %s611_s17 = sshll.u32 %s849_s16, 3  ;;  %vm298_vm4 = vcmask 1043456   ;;  %vm248_vm5 = vcmask 908288   ;;  %vm260_vm6 = vcmask 900096   ;;  %vm237_vm7 = vcmask 916480   ;;  %s612_s11 = sshll.u32 %s849_s16, 5 }
   0xd   : > { %s192_s20 = scalar_lea.vmem %s843_s0, %s611_s17  ;;  %vm214_vm8 = vcmask 1039360   ;;  %vm225_vm9 = vcmask 1031168   ;;  %vm309_vm10 = vcmask 302080   ;;  %vm425_vm11 = vcmask 1040384   ;;  %s197_s14 = scalar_lea.vmem %s847_s4, %s612_s11 }
   0xe   : > { %v198_v0 = vld [vmem:[%s192_s20] sm:$0xff]  ;;  %vm421_vm12 = vcmask 596992   ;;  %vm473_vm13 = vcmask 72704   ;;  %vm527_vm14 = vcmask 490496  }
   0xf   : > { %201 = vst [vmem:[#allocation1] ss:$2 sm:$0xff] %v198_v0 }
  0x16   : > { %v761_v1 = vld.sshfl [vmem:[#allocation1] sm:$0xff pattern:$0x75316420]  ;;  %v763_v2 = vld.sshfl [vmem:[#allocation1 + $0x8] sm:$0xff pattern:$0x75316420] }
  0x17   : > { %207 = vst [vmem:[#allocation1 + $0x1] ss:$2 sm:$0xff] %v198_v0 }
  0x1e   : > { %v208_v3 = vld.sshfl [vmem:[#allocation1] sm:$0xff pattern:$0x75316420]  ;;  %v209_v4 = vld.sshfl [vmem:[#allocation1 + $0x8] sm:$0xff pattern:$0x75316420] }
  0x1f   : > { %218 = vst [vmem:[#allocation1] ss:$2 sm:$0xff] %v198_v0  ;;  %v660_v22 = vpack.i.bf16 %v209_v4, %v208_v3 }
  0x26   : > { %v219_v5 = vld.sshfl [vmem:[#allocation1] sm:$0xff pattern:$0x75316420]  ;;  %v220_v6 = vld.sshfl [vmem:[#allocation1 + $0x8] sm:$0xff pattern:$0x75316420] }
  0x27   : > { %230 = vst [vmem:[#allocation1 + $0x1] ss:$2 sm:$0xff] %v198_v0  ;;  %v650_v25 = vpack.i.bf16 %v220_v6, %v219_v5  ;;  %v199_v5 = vld [vmem:[%s844_s1] sm:$0xff] }
  0x2e   : > { %v231_v7 = vld.sshfl [vmem:[#allocation1] sm:$0xff pattern:$0x75316420]  ;;  %v232_v8 = vld.sshfl [vmem:[#allocation1 + $0x8] sm:$0xff pattern:$0x75316420] }
  0x2f   : > { %241 = vst [vmem:[#allocation1] ss:$2 sm:$0xff] %v198_v0  ;;  %v655_v21 = vpack.i.bf16 %v232_v8, %v231_v7 }
  0x36   : > { %v242_v9 = vld.sshfl [vmem:[#allocation1] sm:$0xff pattern:$0x75316420]  ;;  %v243_v10 = vld.sshfl [vmem:[#allocation1 + $0x8] sm:$0xff pattern:$0x75316420] }
  0x37   : > { %253 = vst [vmem:[#allocation1 + $0x1] ss:$2 sm:$0xff] %v198_v0  ;;  %v630_v16 = vpack.i.bf16 %v243_v10, %v242_v9  ;;  %v721_v9 = vmov 1.0  }
  0x38   : > { %601 = vmatpush.msk.msra.mxu3 %vm425_vm11, %v721_v9  ;;  %599 = vmatpush.msk.msra.mxu2 %vm425_vm11, %v721_v9 }
  0x39   : > { %631 = vrot.lane.b32.xlu2 %v630_v16, %s714_s22 }
  0x3e   : > { %v254_v11 = vld.sshfl [vmem:[#allocation1] sm:$0xff pattern:$0x75316420]  ;;  %v255_v12 = vld.sshfl [vmem:[#allocation1 + $0x8] sm:$0xff pattern:$0x75316420] }
  0x3f   : > { %264 = vst [vmem:[#allocation1] ss:$2 sm:$0xff] %v198_v0  ;;  %v635_v17 = vpack.i.bf16 %v255_v12, %v254_v11 }
  0x41   : > { %636 = vrot.lane.b32.xlu2 %v635_v17, %s716_s24 }
  0x46   : > { %v265_v13 = vld.sshfl [vmem:[#allocation1] sm:$0xff pattern:$0x75316420]  ;;  %v266_v14 = vld.sshfl [vmem:[#allocation1 + $0x8] sm:$0xff pattern:$0x75316420] }
  0x47   : > { %v640_v15 = vpack.i.bf16 %v266_v14, %v265_v13  ;;  %276 = vst [vmem:[#allocation1 + $0x1] ss:$2 sm:$0xff] %v198_v0 }
  0x49   : > { %641 = vrot.lane.b32.xlu1 %v640_v15, %s713_s21  ;;  %661 = vrot.lane.b32.xlu2 %v660_v22, %s719_s27 }
  0x4e   : > { %v277_v18 = vld.sshfl [vmem:[#allocation1] sm:$0xff pattern:$0x75316420]  ;;  %v278_v19 = vld.sshfl [vmem:[#allocation1 + $0x8] sm:$0xff pattern:$0x75316420] }
  0x4f   : > { %v645_v20 = vpack.i.bf16 %v278_v19, %v277_v18  ;;  %287 = vst [vmem:[#allocation1] ss:$2 sm:$0xff] %v198_v0 }
  0x51   : > { %646 = vrot.lane.b32.xlu1 %v645_v20, %s715_s23 }
  0x56   : > { %v288_v23 = vld.sshfl [vmem:[#allocation1] sm:$0xff pattern:$0x75316420]  ;;  %v289_v24 = vld.sshfl [vmem:[#allocation1 + $0x8] sm:$0xff pattern:$0x75316420] }
  0x57   : > { %290 = vrot.lane.b32.xlu0 %v288_v23, %s717_s25 }
  0x59   : > { %656 = vrot.lane.b32.xlu1 %v655_v21, %s718_s26 }
  0x5f   : > { %292 = vrot.lane.b32.xlu0 %v289_v24, %s717_s25 }
  0x67   : > { %651 = vrot.lane.b32.xlu0 %v650_v25, %s720_s28 }
  0x93   : > { %v632_v27 = vpop.permute.xlu2 %631 }
  0x94   : > { %v634_v35 = vunpack.i.h.bf16 %v632_v27  ;;  %v633_v36 = vunpack.i.l.bf16 %v632_v27 }
  0x96   : > { %v249_v48 = vsel %vm248_vm5, %v633_v36, %v634_v35 }
  0x9b   : > { %v637_v30 = vpop.permute.xlu2 %636 }
  0x9c   : > { %v639_v37 = vunpack.i.h.bf16 %v637_v30  ;;  %v638_v38 = vunpack.i.l.bf16 %v637_v30 }
  0x9e   : > { %v261_v49 = vsel %vm260_vm6, %v638_v38, %v639_v37  ;;  %v304_v51 = vsel %vm298_vm4, %v634_v35, %v639_v37 }
  0x9f   : > { %v303_v56 = vsel %vm298_vm4, %v249_v48, %v261_v49  ;;  %v472_v48 = vld [vmem:[%s846_s3 + $0x8] sm:$0xff] }
  0xa3   : > { %v662_v46 = vpop.permute.xlu2 %661 }
  0xa4   : > { %v664_v54 = vunpack.i.h.bf16 %v662_v46  ;;  %v663_v55 = vunpack.i.l.bf16 %v662_v46  ;;  %v471_v46 = vld [vmem:[%s846_s3] sm:$0xff] }
  0xa6   : > { %v215_v61 = vsel %vm214_vm8, %v663_v55, %v664_v54  ;;  %v300_v0 = vsel %vm298_vm4, %v763_v2, %v664_v54 }
  0xa7   : > { %v299_v4 = vsel %vm298_vm4, %v761_v1, %v215_v61 }
  0xbb   : > { %v642_v26 = vpop.permute.xlu1 %641 }
  0xbc   : > { %v644_v31 = vunpack.i.h.bf16 %v642_v26  ;;  %v643_v32 = vunpack.i.l.bf16 %v642_v26 }
  0xbe   : > { %v272_v42 = vsel %vm271_vm1, %v643_v32, %v644_v31 }
  0xc3   : > { %v647_v29 = vpop.permute.xlu1 %646 }
  0xc4   : > { %v649_v33 = vunpack.i.h.bf16 %v647_v29  ;;  %v648_v34 = vunpack.i.l.bf16 %v647_v29 }
  0xc6   : > { %v284_v43 = vsel %vm283_vm2, %v648_v34, %v649_v33  ;;  %v306_v47 = vsel %vm298_vm4, %v644_v31, %v649_v33 }
  0xc7   : > { %v305_v50 = vsel %vm298_vm4, %v272_v42, %v284_v43  ;;  %v362_v42 = vld [vmem:[%s845_s2] sm:$0xff] }
  0xc9   : > { %v291_v28 = vpop.permute.xlu0 %290 }
  0xcb   : > { %v657_v45 = vpop.permute.xlu1 %656 }
  0xcc   : > { %v659_v52 = vunpack.i.h.bf16 %v657_v45  ;;  %v658_v53 = vunpack.i.l.bf16 %v657_v45 }
  0xce   : > { %v238_v60 = vsel %vm237_vm7, %v658_v53, %v659_v52 }
  0xd1   : > { %v293_v39 = vpop.permute.xlu0 %292 }
  0xd2   : > { %v308_v40 = vsel %vm298_vm4, %v293_v39, 1.0  ;;  %v295_v41 = vsel %vm294_vm0, %v291_v28, %v293_v39 }
  0xd3   : > { %597 = vmatpush.msk.msra.mxu1 %vm313_vm3, %v308_v40  ;;  %v307_v44 = vsel %vm298_vm4, %v295_v41, 1.0 }
  0xd4   : > { %595 = vmatpush.msk.msra.mxu0 %vm313_vm3, %v307_v44 }
  0xd5   : > { %352 = vmatpush.msra.mxu1 %v306_v47 }
  0xd6   : > { %332 = vmatpush.msra.mxu0 %v305_v50 }
  0xd7   : > { %353 = vmatpush.msra.mxu1 %v304_v51 }
  0xd8   : > { %333 = vmatpush.msra.mxu0 %v303_v56 }
  0xd9   : > { %v652_v57 = vpop.permute.xlu0 %651 }
  0xda   : > { %v654_v58 = vunpack.i.h.bf16 %v652_v57  ;;  %v653_v59 = vunpack.i.l.bf16 %v652_v57 }
  0xdc   : > { %v302_v62 = vsel %vm298_vm4, %v654_v58, %v659_v52  ;;  %v226_v63 = vsel %vm225_vm9, %v653_v59, %v654_v58 }
  0xdd   : > { %354 = vmatpush.msra.mxu1 %v302_v62  ;;  %v301_v3 = vsel %vm298_vm4, %v226_v63, %v238_v60 }
  0xde   : > { %334 = vmatpush.msra.mxu0 %v301_v3 }
  0xdf   : > { %355 = vmatpush.msra.mxu1 %v300_v0 }
  0xe0   : > { %335 = vmatpush.msra.mxu0 %v299_v4  ;;  %598 = vmatmul.msk.f32.vlgmr.msra.gmra.mxu1 %vm309_vm10, %v199_v5 }
  0xe1   : > { %596 = vmatmul.msk.f32.vlgmr.msra.gmra.mxu0 %vm309_vm10, %v199_v5  ;;  %606 = vmatpush.msk.msrb.mxu1 %vm425_vm11, %v721_v9 }
  0xe2   : > { %603 = vmatpush.msk.msrb.mxu0 %vm425_vm11, %v721_v9 }
 0x15d   : > { %v797_v6 = vpop.f32.mrf.mxu1 }
 0x15e   : > { %v799_v7 = vpop.f32.mrf.mxu0  ;;  %v361_v2 = vmax.f32 %v797_v6, 0.0 }
 0x15f   : > { %v360_v8 = vmax.f32 %v799_v7, 0.0 }
 0x161   : > { %v675_v1 = vpack.i.bf16 %v361_v2, %v360_v8 }
 0x163   : > { %676 = vrot.lane.b32.xlu2 %v675_v1, %s713_s21  ;;  %671 = vrot.lane.b32.xlu1 %v675_v1, %s715_s23 }
 0x164   : > { %666 = vrot.lane.b32.xlu0 %v675_v1, %s717_s25 }
 0x16b   : > { %691 = vrot.lane.b32.xlu2 %v675_v1, %s718_s26  ;;  %686 = vrot.lane.b32.xlu1 %v675_v1, %s714_s22 }
 0x16c   : > { %681 = vrot.lane.b32.xlu0 %v675_v1, %s716_s24 }
 0x173   : > { %701 = vrot.lane.b32.xlu1 %v675_v1, %s719_s27 }
 0x174   : > { %696 = vrot.lane.b32.xlu0 %v675_v1, %s720_s28 }
 0x1bd   : > { %v677_v10 = vpop.permute.xlu2 %676 }
 0x1be   : > { %v678_v17 = vunpack.i.l.bf16 %v677_v10  ;;  %v679_v19 = vunpack.i.h.bf16 %v677_v10 }
 0x1c0   : > { %v404_v22 = vsel %vm271_vm1, %v678_v17, %v679_v19 }
 0x1c5   : > { %v692_v23 = vpop.permute.xlu2 %691 }
 0x1c6   : > { %v694_v29 = vunpack.i.h.bf16 %v692_v23  ;;  %v693_v30 = vunpack.i.l.bf16 %v692_v23 }
 0x1c8   : > { %v383_v34 = vsel %vm237_vm7, %v693_v30, %v694_v29 }
 0x1d5   : > { %v672_v11 = vpop.permute.xlu1 %671 }
 0x1d6   : > { %v667_v12 = vpop.permute.xlu0 %666  ;;  %v673_v13 = vunpack.i.l.bf16 %v672_v11  ;;  %v674_v16 = vunpack.i.h.bf16 %v672_v11 }
 0x1d7   : > { %v668_v14 = vunpack.i.l.bf16 %v667_v12  ;;  %v669_v15 = vunpack.i.h.bf16 %v667_v12 }
 0x1d8   : > { %v411_v20 = vsel %vm283_vm2, %v673_v13, %v674_v16 }
 0x1d9   : > { %456 = vmatpush.msra.mxu3 %v669_v15  ;;  %v418_v18 = vsel %vm294_vm0, %v668_v14, %v669_v15 }
 0x1da   : > { %436 = vmatpush.msra.mxu2 %v418_v18 }
 0x1db   : > { %457 = vmatpush.msra.mxu3 %v674_v16 }
 0x1dc   : > { %437 = vmatpush.msra.mxu2 %v411_v20 }
 0x1dd   : > { %458 = vmatpush.msra.mxu3 %v679_v19  ;;  %v687_v21 = vpop.permute.xlu1 %686 }
 0x1de   : > { %v682_v24 = vpop.permute.xlu0 %681  ;;  %438 = vmatpush.msra.mxu2 %v404_v22  ;;  %v688_v25 = vunpack.i.l.bf16 %v687_v21  ;;  %v689_v28 = vunpack.i.h.bf16 %v687_v21 }
 0x1df   : > { %v683_v26 = vunpack.i.l.bf16 %v682_v24  ;;  %v684_v27 = vunpack.i.h.bf16 %v682_v24 }
 0x1e0   : > { %v390_v32 = vsel %vm248_vm5, %v688_v25, %v689_v28 }
 0x1e1   : > { %459 = vmatpush.msra.mxu3 %v684_v27  ;;  %v397_v31 = vsel %vm260_vm6, %v683_v26, %v684_v27 }
 0x1e2   : > { %439 = vmatpush.msra.mxu2 %v397_v31 }
 0x1e3   : > { %460 = vmatpush.msra.mxu3 %v689_v28 }
 0x1e4   : > { %440 = vmatpush.msra.mxu2 %v390_v32 }
 0x1e5   : > { %461 = vmatpush.msra.mxu3 %v694_v29  ;;  %v702_v33 = vpop.permute.xlu1 %701 }
 0x1e6   : > { %v697_v35 = vpop.permute.xlu0 %696  ;;  %441 = vmatpush.msra.mxu2 %v383_v34  ;;  %v704_v36 = vunpack.i.h.bf16 %v702_v33  ;;  %v703_v37 = vunpack.i.l.bf16 %v702_v33 }
 0x1e7   : > { %v699_v38 = vunpack.i.h.bf16 %v697_v35  ;;  %v698_v39 = vunpack.i.l.bf16 %v697_v35 }
 0x1e8   : > { %v369_v41 = vsel %vm214_vm8, %v703_v37, %v704_v36 }
 0x1e9   : > { %462 = vmatpush.msra.mxu3 %v699_v38  ;;  %v376_v40 = vsel %vm225_vm9, %v698_v39, %v699_v38 }
 0x1ea   : > { %442 = vmatpush.msra.mxu2 %v376_v40 }
 0x1eb   : > { %463 = vmatpush.msra.mxu3 %v704_v36 }
 0x1ec   : > { %443 = vmatpush.msra.mxu2 %v369_v41 }
 0x1ed   : > { %464 = vmatpush.msra.mxu3 %v361_v2 }
 0x1ee   : > { %444 = vmatpush.msra.mxu2 %v360_v8  ;;  %602 = vmatmul.msk.f32.vlgmr.msra.gmra.mxu3 %vm421_vm12, %v362_v42 }
 0x1ef   : > { %600 = vmatmul.msk.f32.vlgmr.msra.gmra.mxu2 %vm421_vm12, %v362_v42 }
 0x271   : > { %v466_v43 = vpop.f32.mrf.mxu3 }
 0x272   : > { %v446_v44 = vpop.f32.mrf.mxu2  ;;  %v470_v45 = vmax.f32 %v466_v43, 0.0 }
 0x273   : > { %v469_v47 = vmax.f32 %v446_v44, 0.0 }
 0x274   : > { %518 = vmatpush.msrb.mxu1 %v470_v45 }
 0x275   : > { %495 = vmatpush.msrb.mxu0 %v469_v47  ;;  %607 = vmatmul.msk.f32.vlgmr.msrb.gmra.mxu1 %vm473_vm13, %v471_v46 }
 0x276   : > { %604 = vmatmul.msk.f32.vlgmr.msrb.gmra.mxu0 %vm473_vm13, %v471_v46 }
 0x27d   : > { %608 = vmatmul.msk.f32.gmra.mxu1 %vm473_vm13, %v472_v48 }
 0x27e   : > { %605 = vmatmul.msk.f32.gmra.mxu0 %vm473_vm13, %v472_v48 }
 0x2f2   : > { %v520_v49 = vpop.f32.mrf.mxu1 }
 0x2f3   : > { %v497_v50 = vpop.f32.mrf.mxu0  ;;  %528 = vst.msk [vmem:[%s197_s14 + $0x8] sm:$0xff] %vm527_vm14, %v520_v49 }
 0x2f4   : > { %526 = vst [vmem:[%s197_s14] sm:$0xff] %v497_v50 }
 0x2fa   : > { %v523_v51 = vpop.f32.mrf.mxu1 }
 0x2fb   : > { %v500_v52 = vpop.f32.mrf.mxu0  ;;  %530 = vst.msk [vmem:[%s197_s14 + $0x18] sm:$0xff] %vm527_vm14, %v523_v51 }
 0x2fc   : > { %529 = vst [vmem:[%s197_s14 + $0x10] sm:$0xff] %v500_v52 }
 0x2fd PF: > { %s14_s15 = sadd.s32 1, %s711_s15  }
 0x2fe   : > { %p11_p4 = scmp.ge.s32.totalorder %s14_s15, 4  }
 0x300   :  { %13 = sbr.rel (!%p11_p4) target bundleno = 1 (0x1), region = 70 }

</bundles_post_ra>
